<compile_context>
chip_gen: v7x
topology: tpu7x:2x2x1
jax: 0.10.0
libtpu: 0.0.40
codegen_flags: <defaults>
</compile_context>

<pallas_src>
import math
import functools

import jax
import jax.numpy as jnp
from jax.experimental import pallas as pl
from jax.experimental.pallas import tpu as pltpu

EPS = 1e-5
NEG_INF = -1e30   # finite fill: avoids NaN from (inf - inf) on fully-masked rows


def _block_kernel(x_ref, ln1g_ref, ln1b_ref,
                  wqkv_ref, bqkv_ref,
                  wo_ref, bo_ref, ln2g_ref, ln2b_ref,
                  w1_ref, b1_ref, w2_ref, b2_ref,
                  o_ref, *, n_head, causal):
    x = x_ref[0]                              # (T, C) f32 residual stream
    T, C = x.shape
    d_head = C // n_head
    scale = 1.0 / math.sqrt(d_head)

    def layernorm(h, g, b):                   # keep normalization path in f32
        mu = jnp.mean(h, axis=-1, keepdims=True)
        var = jnp.mean((h - mu) ** 2, axis=-1, keepdims=True)
        return (h - mu) * jax.lax.rsqrt(var + EPS) * g + b

    # ---------------- attention branch ----------------
    h = layernorm(x, ln1g_ref[0], ln1b_ref[0]).astype(jnp.bfloat16)   # (T, C) bf16

    # single fused lane-dense QKV projection: (T,C) @ (C,3C), f32 accumulate on the MXU
    qkv = jnp.dot(h, wqkv_ref[...],
                  preferred_element_type=jnp.float32) + bqkv_ref[0]   # (T, 3C) f32

    q = qkv[:, :C] * scale                     # fold softmax scale into q
    k = qkv[:, C:2 * C]
    v = qkv[:, 2 * C:]

    def to_heads(a):                           # (T, C) -> (H, T, Dh), one relayout
        return jnp.transpose(a.reshape(T, n_head, d_head), (1, 0, 2))

    qh = to_heads(q).astype(jnp.bfloat16)
    kh = to_heads(k).astype(jnp.bfloat16)
    vh = to_heads(v).astype(jnp.bfloat16)

    att = jnp.einsum('hqd,hkd->hqk', qh, kh,
                     preferred_element_type=jnp.float32)               # (H, T, T) f32
    if causal:
        row = jax.lax.broadcasted_iota(jnp.int32, (T, T), 0)
        col = jax.lax.broadcasted_iota(jnp.int32, (T, T), 1)
        att = jnp.where((col <= row)[None], att, NEG_INF)

    m = jnp.max(att, axis=-1, keepdims=True)
    p = jnp.exp(att - m)                       # un-normalized probabilities, in [0, 1]
    denom = jnp.sum(p, axis=-1, keepdims=True)                         # (H, T, 1)

    yh = jnp.einsum('hqk,hkd->hqd', p.astype(jnp.bfloat16), vh,
                    preferred_element_type=jnp.float32)                # (H, T, Dh)
    yh = yh / denom                            # post-PV normalization (exact, O(H*T*Dh))

    # relayout heads back to (T, C) once; single lane-dense output projection
    y = jnp.transpose(yh, (1, 0, 2)).reshape(T, C)
    attn_out = jnp.dot(y.astype(jnp.bfloat16), wo_ref[...],
                       preferred_element_type=jnp.float32) + bo_ref[0]
    x = x + attn_out

    # ---------------- MLP branch ----------------
    h2 = layernorm(x, ln2g_ref[0], ln2b_ref[0])
    m1 = jnp.dot(h2.astype(jnp.bfloat16), w1_ref[...],
                 preferred_element_type=jnp.float32) + b1_ref[0]
    m1 = jnp.maximum(m1, 0.0)
    mlp_out = jnp.dot(m1.astype(jnp.bfloat16), w2_ref[...],
                      preferred_element_type=jnp.float32) + b2_ref[0]

    o_ref[0] = x + mlp_out


def block_forward(x, params, *, n_head, causal):
    (ln1g, ln1b, wq, bq, wk, bk, wv, bv, wo, bo,
     ln2g, ln2b, w1, b1, w2, b2) = params
    B, T, C = x.shape
    H = w1.shape[1]

    # --- repack weights once in plain JAX (outside the kernel) ---
    wqkv = jnp.concatenate([wq, wk, wv], axis=1).astype(jnp.bfloat16)   # (C, 3C)
    bqkv = jnp.concatenate([bq, bk, bv], axis=1)                        # (1, 3C) f32
    wo_b = wo.astype(jnp.bfloat16)
    w1_b = w1.astype(jnp.bfloat16)
    w2_b = w2.astype(jnp.bfloat16)

    kernel_params = (ln1g, ln1b, wqkv, bqkv, wo_b, bo,
                     ln2g, ln2b, w1_b, b1, w2_b, b2)

    def full(shape):   # grid-invariant block (same tile every grid step)
        return pl.BlockSpec(shape, lambda b: (0,) * len(shape))

    in_specs = [
        pl.BlockSpec((1, T, C), lambda b: (b, 0, 0)),        # x
        full((1, C)), full((1, C)),                           # ln1 gamma/beta
        full((C, 3 * C)), full((1, 3 * C)),                   # fused Wqkv, bqkv
        full((C, C)), full((1, C)),                           # Wo, bo
        full((1, C)), full((1, C)),                           # ln2 gamma/beta
        full((C, H)), full((1, H)),                           # W1, b1
        full((H, C)), full((1, C)),                           # W2, b2
    ]

    kernel = functools.partial(_block_kernel, n_head=n_head, causal=causal)

    return pl.pallas_call(
        kernel,
        out_shape=jax.ShapeDtypeStruct((B, T, C), jnp.float32),
        grid_spec=pltpu.PrefetchScalarGridSpec(
            num_scalar_prefetch=0,
            grid=(B,),
            in_specs=in_specs,
            out_specs=pl.BlockSpec((1, T, C), lambda b: (b, 0, 0)),
        ),
        compiler_params=pltpu.CompilerParams(
            dimension_semantics=("parallel",),
            vmem_limit_bytes=48 * 1024 * 1024,
        ),
    )(x, *kernel_params)


def reference_forward(x, params, *, n_head, causal):
    """Pure-JAX f32 reference mirroring the PyTorch forward."""
    (ln1g, ln1b, wq, bq, wk, bk, wv, bv, wo, bo,
     ln2g, ln2b, w1, b1, w2, b2) = params
    B, T, C = x.shape
    dh = C // n_head

    def ln(h, g, b):
        mu = jnp.mean(h, axis=-1, keepdims=True)
        var = jnp.mean((h - mu) ** 2, axis=-1, keepdims=True)
        return (h - mu) / jnp.sqrt(var + EPS) * g + b

    h = ln(x, ln1g[0], ln1b[0])
    q = (h @ wq + bq[0]).reshape(B, T, n_head, dh).transpose(0, 2, 1, 3)
    k = (h @ wk + bk[0]).reshape(B, T, n_head, dh).transpose(0, 2, 1, 3)
    v = (h @ wv + bv[0]).reshape(B, T, n_head, dh).transpose(0, 2, 1, 3)
    att = jnp.einsum("bhqd,bhkd->bhqk", q, k) / math.sqrt(dh)
    if causal:
        mask = jnp.tril(jnp.ones((T, T), bool))
        att = jnp.where(mask[None, None], att, -jnp.inf)
    p = jax.nn.softmax(att, axis=-1)
    y = jnp.einsum("bhqk,bhkd->bhqd", p, v).transpose(0, 2, 1, 3).reshape(B, T, C)
    x = x + (y @ wo + bo[0])
    h2 = ln(x, ln2g[0], ln2b[0])
    m = jax.nn.relu(h2 @ w1 + b1[0])
    return x + (m @ w2 + b2[0])


def init_params(key, n_embd):
    C, H = n_embd, 4 * n_embd
    ks = jax.random.split(key, 16)

    def w(k, shape, fan_in):
        return jax.random.uniform(k, shape, jnp.float32,
                                  -1.0 / math.sqrt(fan_in), 1.0 / math.sqrt(fan_in))

    ln1g = jnp.ones((1, C), jnp.float32)
    ln1b = jnp.zeros((1, C), jnp.float32)
    wq, bq = w(ks[0], (C, C), C), w(ks[1], (1, C), C)
    wk, bk = w(ks[2], (C, C), C), w(ks[3], (1, C), C)
    wv, bv = w(ks[4], (C, C), C), w(ks[5], (1, C), C)
    wo, bo = w(ks[6], (C, C), C), w(ks[7], (1, C), C)
    ln2g = jnp.ones((1, C), jnp.float32)
    ln2b = jnp.zeros((1, C), jnp.float32)
    w1, b1 = w(ks[8], (C, H), C), w(ks[9], (1, H), C)
    w2, b2 = w(ks[10], (H, C), H), w(ks[11], (1, C), H)
    return (ln1g, ln1b, wq, bq, wk, bk, wv, bv, wo, bo,
            ln2g, ln2b, w1, b1, w2, b2)


if __name__ == "__main__":
    B, T, C = 2, 8, 32          # batch, seq (== block_size), n_embd
    n_head, causal = 4, True

    key = jax.random.PRNGKey(0)
    kx, kp = jax.random.split(key)
    x = jax.random.normal(kx, (B, T, C), jnp.float32)
    params = init_params(kp, C)

    out = block_forward(x, params, n_head=n_head, causal=causal)
    out = jax.block_until_ready(out)

    ref = reference_forward(x, params, n_head=n_head, causal=causal)
    # bf16 MXU operands (f32 accumulation) => loosen tolerance vs the f32 reference
    assert jnp.allclose(out, ref, atol=2e-2, rtol=2e-2), "mismatch vs reference"

    print("KERNEL_OK")
</pallas_src>

<mosaic_0001>
module attributes {stable_mosaic.version = 11 : i64} {
  func.func @_block_kernel(%arg0: i32, %arg1: memref<1x8x32xf32, #tpu.memory_space<vmem>>, %arg2: memref<1x32xf32, #tpu.memory_space<vmem>>, %arg3: memref<1x32xf32, #tpu.memory_space<vmem>>, %arg4: memref<32x96xbf16, #tpu.memory_space<vmem>>, %arg5: memref<1x96xf32, #tpu.memory_space<vmem>>, %arg6: memref<32x32xbf16, #tpu.memory_space<vmem>>, %arg7: memref<1x32xf32, #tpu.memory_space<vmem>>, %arg8: memref<1x32xf32, #tpu.memory_space<vmem>>, %arg9: memref<1x32xf32, #tpu.memory_space<vmem>>, %arg10: memref<32x128xbf16, #tpu.memory_space<vmem>>, %arg11: memref<1x128xf32, #tpu.memory_space<vmem>>, %arg12: memref<128x32xbf16, #tpu.memory_space<vmem>>, %arg13: memref<1x32xf32, #tpu.memory_space<vmem>>, %arg14: memref<1x8x32xf32, #tpu.memory_space<vmem>>) attributes {dimension_semantics = [#tpu.dimension_semantics<parallel>], iteration_bounds = array<i64: 2>, scalar_prefetch = 0 : i64, scratch_operands = 0 : i64, tpu.core_type = #tpu.core_type<tc>, window_params = [{transform_indices = @transform_0, window_bounds = array<i64: 1, 8, 32>}, {pipeline_mode = #tpu.pipeline_mode<synchronous>, transform_indices = @transform_1, window_bounds = array<i64: 1, 32>}, {pipeline_mode = #tpu.pipeline_mode<synchronous>, transform_indices = @transform_2, window_bounds = array<i64: 1, 32>}, {pipeline_mode = #tpu.pipeline_mode<synchronous>, transform_indices = @transform_3, window_bounds = array<i64: 32, 96>}, {pipeline_mode = #tpu.pipeline_mode<synchronous>, transform_indices = @transform_4, window_bounds = array<i64: 1, 96>}, {pipeline_mode = #tpu.pipeline_mode<synchronous>, transform_indices = @transform_5, window_bounds = array<i64: 32, 32>}, {pipeline_mode = #tpu.pipeline_mode<synchronous>, transform_indices = @transform_6, window_bounds = array<i64: 1, 32>}, {pipeline_mode = #tpu.pipeline_mode<synchronous>, transform_indices = @transform_7, window_bounds = array<i64: 1, 32>}, {pipeline_mode = #tpu.pipeline_mode<synchronous>, transform_indices = @transform_8, window_bounds = array<i64: 1, 32>}, {pipeline_mode = #tpu.pipeline_mode<synchronous>, transform_indices = @transform_9, window_bounds = array<i64: 32, 128>}, {pipeline_mode = #tpu.pipeline_mode<synchronous>, transform_indices = @transform_10, window_bounds = array<i64: 1, 128>}, {pipeline_mode = #tpu.pipeline_mode<synchronous>, transform_indices = @transform_11, window_bounds = array<i64: 128, 32>}, {pipeline_mode = #tpu.pipeline_mode<synchronous>, transform_indices = @transform_12, window_bounds = array<i64: 1, 32>}, {transform_indices = @transform_13, window_bounds = array<i64: 1, 8, 32>}]} {
    %c0 = arith.constant 0 : index
    %c0_0 = arith.constant 0 : index
    %c0_1 = arith.constant 0 : index
    %0 = vector.load %arg1[%c0, %c0_0, %c0_1] : memref<1x8x32xf32, #tpu.memory_space<vmem>>, vector<1x8x32xf32>
    %1 = vector.shape_cast %0 : vector<1x8x32xf32> to vector<8x32xf32>
    %c0_2 = arith.constant 0 : index
    %c0_3 = arith.constant 0 : index
    %2 = vector.load %arg2[%c0_2, %c0_3] : memref<1x32xf32, #tpu.memory_space<vmem>>, vector<1x32xf32>
    %3 = vector.shape_cast %2 : vector<1x32xf32> to vector<32xf32>
    %c0_4 = arith.constant 0 : index
    %c0_5 = arith.constant 0 : index
    %4 = vector.load %arg3[%c0_4, %c0_5] : memref<1x32xf32, #tpu.memory_space<vmem>>, vector<1x32xf32>
    %5 = vector.shape_cast %4 : vector<1x32xf32> to vector<32xf32>
    %cst = arith.constant dense<0.000000e+00> : vector<8xf32>
    %6 = vector.multi_reduction <add>, %1, %cst [1] : vector<8x32xf32> to vector<8xf32>
    %7 = vector.shape_cast %6 : vector<8xf32> to vector<8x1xf32>
    %cst_6 = arith.constant 3.200000e+01 : f32
    %8 = vector.broadcast %cst_6 : f32 to vector<8x1xf32>
    %9 = arith.divf %7, %8 : vector<8x1xf32>
    %10 = vector.broadcast %9 : vector<8x1xf32> to vector<8x32xf32>
    %11 = arith.subf %1, %10 : vector<8x32xf32>
    %12 = arith.mulf %11, %11 : vector<8x32xf32>
    %cst_7 = arith.constant dense<0.000000e+00> : vector<8xf32>
    %13 = vector.multi_reduction <add>, %12, %cst_7 [1] : vector<8x32xf32> to vector<8xf32>
    %14 = vector.shape_cast %13 : vector<8xf32> to vector<8x1xf32>
    %cst_8 = arith.constant 3.200000e+01 : f32
    %15 = vector.broadcast %cst_8 : f32 to vector<8x1xf32>
    %16 = arith.divf %14, %15 : vector<8x1xf32>
    %17 = vector.broadcast %9 : vector<8x1xf32> to vector<8x32xf32>
    %18 = arith.subf %1, %17 : vector<8x32xf32>
    %cst_9 = arith.constant 9.99999974E-6 : f32
    %19 = vector.broadcast %cst_9 : f32 to vector<8x1xf32>
    %20 = arith.addf %16, %19 : vector<8x1xf32>
    %21 = math.rsqrt %20 : vector<8x1xf32>
    %22 = vector.broadcast %21 : vector<8x1xf32> to vector<8x32xf32>
    %23 = arith.mulf %18, %22 : vector<8x32xf32>
    %24 = vector.shape_cast %3 : vector<32xf32> to vector<1x32xf32>
    %25 = vector.broadcast %24 : vector<1x32xf32> to vector<8x32xf32>
    %26 = arith.mulf %23, %25 : vector<8x32xf32>
    %27 = vector.shape_cast %5 : vector<32xf32> to vector<1x32xf32>
    %28 = vector.broadcast %27 : vector<1x32xf32> to vector<8x32xf32>
    %29 = arith.addf %26, %28 : vector<8x32xf32>
    %30 = arith.truncf %29 : vector<8x32xf32> to vector<8x32xbf16>
    %c0_10 = arith.constant 0 : index
    %c0_11 = arith.constant 0 : index
    %31 = vector.load %arg4[%c0_10, %c0_11] : memref<32x96xbf16, #tpu.memory_space<vmem>>, vector<32x96xbf16>
    %cst_12 = arith.constant dense<0.000000e+00> : vector<8x96xf32>
    %32 = tpu.matmul %30, %31, %cst_12 {dimension_numbers = #tpu.dot_dimension_numbers<[1], [0], [0], [1], [0, 0, 1, 1], [], []>} : vector<8x32xbf16>, vector<32x96xbf16>, vector<8x96xf32> -> vector<8x96xf32>
    %c0_13 = arith.constant 0 : index
    %c0_14 = arith.constant 0 : index
    %33 = vector.load %arg5[%c0_13, %c0_14] : memref<1x96xf32, #tpu.memory_space<vmem>>, vector<1x96xf32>
    %34 = vector.shape_cast %33 : vector<1x96xf32> to vector<96xf32>
    %35 = vector.shape_cast %34 : vector<96xf32> to vector<1x96xf32>
    %36 = vector.broadcast %35 : vector<1x96xf32> to vector<8x96xf32>
    %37 = arith.addf %32, %36 : vector<8x96xf32>
    %38 = vector.extract_strided_slice %37 {offsets = [0, 0], sizes = [8, 32], strides = [1, 1]} : vector<8x96xf32> to vector<8x32xf32>
    %cst_15 = arith.constant 0.353553385 : f32
    %39 = vector.broadcast %cst_15 : f32 to vector<8x32xf32>
    %40 = arith.mulf %38, %39 : vector<8x32xf32>
    %41 = vector.extract_strided_slice %37 {offsets = [0, 32], sizes = [8, 32], strides = [1, 1]} : vector<8x96xf32> to vector<8x32xf32>
    %42 = vector.extract_strided_slice %37 {offsets = [0, 64], sizes = [8, 32], strides = [1, 1]} : vector<8x96xf32> to vector<8x32xf32>
    %43 = vector.shape_cast %40 : vector<8x32xf32> to vector<8x4x8xf32>
    %44 = tpu.transpose %43, [1, 0, 2] : vector<8x4x8xf32> -> vector<4x8x8xf32>
    %45 = arith.truncf %44 : vector<4x8x8xf32> to vector<4x8x8xbf16>
    %46 = vector.shape_cast %41 : vector<8x32xf32> to vector<8x4x8xf32>
    %47 = tpu.transpose %46, [1, 0, 2] : vector<8x4x8xf32> -> vector<4x8x8xf32>
    %48 = arith.truncf %47 : vector<4x8x8xf32> to vector<4x8x8xbf16>
    %49 = vector.shape_cast %42 : vector<8x32xf32> to vector<8x4x8xf32>
    %50 = tpu.transpose %49, [1, 0, 2] : vector<8x4x8xf32> -> vector<4x8x8xf32>
    %51 = arith.truncf %50 : vector<4x8x8xf32> to vector<4x8x8xbf16>
    "tpu.trace_start"() <{level = 10 : i32, message = "hqd,hkd->hqk"}> : () -> ()
    %cst_16 = arith.constant dense<0.000000e+00> : vector<4x8x8xf32>
    %52 = tpu.matmul %45, %48, %cst_16 {dimension_numbers = #tpu.dot_dimension_numbers<[2], [2], [1], [1], [0, 0, 0, 1, 1, 1], [0], [0]>} : vector<4x8x8xbf16>, vector<4x8x8xbf16>, vector<4x8x8xf32> -> vector<4x8x8xf32>
    "tpu.trace_stop"() : () -> ()
    %53 = tpu.iota {dimensions = array<i32: 0>} : vector<8x8xi32>
    %54 = tpu.iota {dimensions = array<i32: 1>} : vector<8x8xi32>
    %55 = arith.cmpi sle, %54, %53 : vector<8x8xi32>
    %56 = vector.shape_cast %55 : vector<8x8xi1> to vector<1x8x8xi1>
    %cst_17 = arith.constant -1.000000e+30 : f32
    %57 = vector.shape_cast %56 : vector<1x8x8xi1> to vector<1x8x8xi1>
    %58 = vector.broadcast %57 : vector<1x8x8xi1> to vector<4x8x8xi1>
    %59 = vector.broadcast %cst_17 : f32 to vector<4x8x8xf32>
    %60 = arith.select %58, %52, %59 : vector<4x8x8xi1>, vector<4x8x8xf32>
    %cst_18 = arith.constant dense<0xFF800000> : vector<4x8xf32>
    %61 = vector.multi_reduction <maximumf>, %60, %cst_18 [2] : vector<4x8x8xf32> to vector<4x8xf32>
    %62 = vector.shape_cast %61 : vector<4x8xf32> to vector<4x8x1xf32>
    %63 = vector.broadcast %62 : vector<4x8x1xf32> to vector<4x8x8xf32>
    %64 = arith.subf %60, %63 : vector<4x8x8xf32>
    %65 = math.exp %64 : vector<4x8x8xf32>
    %cst_19 = arith.constant dense<0.000000e+00> : vector<4x8xf32>
    %66 = vector.multi_reduction <add>, %65, %cst_19 [2] : vector<4x8x8xf32> to vector<4x8xf32>
    %67 = vector.shape_cast %66 : vector<4x8xf32> to vector<4x8x1xf32>
    %68 = arith.truncf %65 : vector<4x8x8xf32> to vector<4x8x8xbf16>
    "tpu.trace_start"() <{level = 10 : i32, message = "hqk,hkd->hqd"}> : () -> ()
    %cst_20 = arith.constant dense<0.000000e+00> : vector<4x8x8xf32>
    %69 = tpu.matmul %68, %51, %cst_20 {dimension_numbers = #tpu.dot_dimension_numbers<[2], [1], [1], [2], [0, 0, 0, 1, 1, 2], [0], [0]>} : vector<4x8x8xbf16>, vector<4x8x8xbf16>, vector<4x8x8xf32> -> vector<4x8x8xf32>
    "tpu.trace_stop"() : () -> ()
    %70 = vector.broadcast %67 : vector<4x8x1xf32> to vector<4x8x8xf32>
    %71 = arith.divf %69, %70 : vector<4x8x8xf32>
    %72 = tpu.transpose %71, [1, 0, 2] : vector<4x8x8xf32> -> vector<8x4x8xf32>
    %73 = vector.shape_cast %72 : vector<8x4x8xf32> to vector<8x32xf32>
    %74 = arith.truncf %73 : vector<8x32xf32> to vector<8x32xbf16>
    %c0_21 = arith.constant 0 : index
    %c0_22 = arith.constant 0 : index
    %75 = vector.load %arg6[%c0_21, %c0_22] : memref<32x32xbf16, #tpu.memory_space<vmem>>, vector<32x32xbf16>
    %cst_23 = arith.constant dense<0.000000e+00> : vector<8x32xf32>
    %76 = tpu.matmul %74, %75, %cst_23 {dimension_numbers = #tpu.dot_dimension_numbers<[1], [0], [0], [1], [0, 0, 1, 1], [], []>} : vector<8x32xbf16>, vector<32x32xbf16>, vector<8x32xf32> -> vector<8x32xf32>
    %c0_24 = arith.constant 0 : index
    %c0_25 = arith.constant 0 : index
    %77 = vector.load %arg7[%c0_24, %c0_25] : memref<1x32xf32, #tpu.memory_space<vmem>>, vector<1x32xf32>
    %78 = vector.shape_cast %77 : vector<1x32xf32> to vector<32xf32>
    %79 = vector.shape_cast %78 : vector<32xf32> to vector<1x32xf32>
    %80 = vector.broadcast %79 : vector<1x32xf32> to vector<8x32xf32>
    %81 = arith.addf %76, %80 : vector<8x32xf32>
    %82 = arith.addf %1, %81 : vector<8x32xf32>
    %c0_26 = arith.constant 0 : index
    %c0_27 = arith.constant 0 : index
    %83 = vector.load %arg8[%c0_26, %c0_27] : memref<1x32xf32, #tpu.memory_space<vmem>>, vector<1x32xf32>
    %84 = vector.shape_cast %83 : vector<1x32xf32> to vector<32xf32>
    %c0_28 = arith.constant 0 : index
    %c0_29 = arith.constant 0 : index
    %85 = vector.load %arg9[%c0_28, %c0_29] : memref<1x32xf32, #tpu.memory_space<vmem>>, vector<1x32xf32>
    %86 = vector.shape_cast %85 : vector<1x32xf32> to vector<32xf32>
    %cst_30 = arith.constant dense<0.000000e+00> : vector<8xf32>
    %87 = vector.multi_reduction <add>, %82, %cst_30 [1] : vector<8x32xf32> to vector<8xf32>
    %88 = vector.shape_cast %87 : vector<8xf32> to vector<8x1xf32>
    %cst_31 = arith.constant 3.200000e+01 : f32
    %89 = vector.broadcast %cst_31 : f32 to vector<8x1xf32>
    %90 = arith.divf %88, %89 : vector<8x1xf32>
    %91 = vector.broadcast %90 : vector<8x1xf32> to vector<8x32xf32>
    %92 = arith.subf %82, %91 : vector<8x32xf32>
    %93 = arith.mulf %92, %92 : vector<8x32xf32>
    %cst_32 = arith.constant dense<0.000000e+00> : vector<8xf32>
    %94 = vector.multi_reduction <add>, %93, %cst_32 [1] : vector<8x32xf32> to vector<8xf32>
    %95 = vector.shape_cast %94 : vector<8xf32> to vector<8x1xf32>
    %cst_33 = arith.constant 3.200000e+01 : f32
    %96 = vector.broadcast %cst_33 : f32 to vector<8x1xf32>
    %97 = arith.divf %95, %96 : vector<8x1xf32>
    %98 = vector.broadcast %90 : vector<8x1xf32> to vector<8x32xf32>
    %99 = arith.subf %82, %98 : vector<8x32xf32>
    %cst_34 = arith.constant 9.99999974E-6 : f32
    %100 = vector.broadcast %cst_34 : f32 to vector<8x1xf32>
    %101 = arith.addf %97, %100 : vector<8x1xf32>
    %102 = math.rsqrt %101 : vector<8x1xf32>
    %103 = vector.broadcast %102 : vector<8x1xf32> to vector<8x32xf32>
    %104 = arith.mulf %99, %103 : vector<8x32xf32>
    %105 = vector.shape_cast %84 : vector<32xf32> to vector<1x32xf32>
    %106 = vector.broadcast %105 : vector<1x32xf32> to vector<8x32xf32>
    %107 = arith.mulf %104, %106 : vector<8x32xf32>
    %108 = vector.shape_cast %86 : vector<32xf32> to vector<1x32xf32>
    %109 = vector.broadcast %108 : vector<1x32xf32> to vector<8x32xf32>
    %110 = arith.addf %107, %109 : vector<8x32xf32>
    %111 = arith.truncf %110 : vector<8x32xf32> to vector<8x32xbf16>
    %c0_35 = arith.constant 0 : index
    %c0_36 = arith.constant 0 : index
    %112 = vector.load %arg10[%c0_35, %c0_36] : memref<32x128xbf16, #tpu.memory_space<vmem>>, vector<32x128xbf16>
    %cst_37 = arith.constant dense<0.000000e+00> : vector<8x128xf32>
    %113 = tpu.matmul %111, %112, %cst_37 {dimension_numbers = #tpu.dot_dimension_numbers<[1], [0], [0], [1], [0, 0, 1, 1], [], []>} : vector<8x32xbf16>, vector<32x128xbf16>, vector<8x128xf32> -> vector<8x128xf32>
    %c0_38 = arith.constant 0 : index
    %c0_39 = arith.constant 0 : index
    %114 = vector.load %arg11[%c0_38, %c0_39] : memref<1x128xf32, #tpu.memory_space<vmem>>, vector<1x128xf32>
    %115 = vector.shape_cast %114 : vector<1x128xf32> to vector<128xf32>
    %116 = vector.shape_cast %115 : vector<128xf32> to vector<1x128xf32>
    %117 = vector.broadcast %116 : vector<1x128xf32> to vector<8x128xf32>
    %118 = arith.addf %113, %117 : vector<8x128xf32>
    %cst_40 = arith.constant 0.000000e+00 : f32
    %119 = vector.broadcast %cst_40 : f32 to vector<8x128xf32>
    %120 = arith.maximumf %118, %119 : vector<8x128xf32>
    %121 = arith.truncf %120 : vector<8x128xf32> to vector<8x128xbf16>
    %c0_41 = arith.constant 0 : index
    %c0_42 = arith.constant 0 : index
    %122 = vector.load %arg12[%c0_41, %c0_42] : memref<128x32xbf16, #tpu.memory_space<vmem>>, vector<128x32xbf16>
    %cst_43 = arith.constant dense<0.000000e+00> : vector<8x32xf32>
    %123 = tpu.matmul %121, %122, %cst_43 {dimension_numbers = #tpu.dot_dimension_numbers<[1], [0], [0], [1], [0, 0, 1, 1], [], []>} : vector<8x128xbf16>, vector<128x32xbf16>, vector<8x32xf32> -> vector<8x32xf32>
    %c0_44 = arith.constant 0 : index
    %c0_45 = arith.constant 0 : index
    %124 = vector.load %arg13[%c0_44, %c0_45] : memref<1x32xf32, #tpu.memory_space<vmem>>, vector<1x32xf32>
    %125 = vector.shape_cast %124 : vector<1x32xf32> to vector<32xf32>
    %126 = vector.shape_cast %125 : vector<32xf32> to vector<1x32xf32>
    %127 = vector.broadcast %126 : vector<1x32xf32> to vector<8x32xf32>
    %128 = arith.addf %123, %127 : vector<8x32xf32>
    %129 = arith.addf %82, %128 : vector<8x32xf32>
    %c0_46 = arith.constant 0 : index
    %c0_47 = arith.constant 0 : index
    %c0_48 = arith.constant 0 : index
    %130 = vector.load %arg14[%c0_46, %c0_47, %c0_48] : memref<1x8x32xf32, #tpu.memory_space<vmem>>, vector<1x8x32xf32>
    %131 = vector.shape_cast %130 : vector<1x8x32xf32> to vector<8x32xf32>
    %132 = vector.shape_cast %129 : vector<8x32xf32> to vector<1x8x32xf32>
    tpu.vector_store %arg14[%c0_46, %c0_47, %c0_48], %132 {strides = array<i32>} : memref<1x8x32xf32, #tpu.memory_space<vmem>>, vector<1x8x32xf32>,
    return
  }
  func.func @transform_0(%arg0: i32) -> (i32, i32, i32) {
    %c0_i32 = arith.constant 0 : i32
    %c0_i32_0 = arith.constant 0 : i32
    %c0_i32_1 = arith.constant 0 : i32
    return %arg0, %c0_i32, %c0_i32_0 : i32, i32, i32
  }
  func.func @transform_1(%arg0: i32) -> (i32, i32) {
    %c0_i32 = arith.constant 0 : i32
    %c0_i32_0 = arith.constant 0 : i32
    %c0_i32_1 = arith.constant 0 : i32
    return %c0_i32, %c0_i32_0 : i32, i32
  }
  func.func @transform_2(%arg0: i32) -> (i32, i32) {
    %c0_i32 = arith.constant 0 : i32
    %c0_i32_0 = arith.constant 0 : i32
    %c0_i32_1 = arith.constant 0 : i32
    return %c0_i32, %c0_i32_0 : i32, i32
  }
  func.func @transform_3(%arg0: i32) -> (i32, i32) {
    %c0_i32 = arith.constant 0 : i32
    %c0_i32_0 = arith.constant 0 : i32
    %c0_i32_1 = arith.constant 0 : i32
    return %c0_i32, %c0_i32_0 : i32, i32
  }
  func.func @transform_4(%arg0: i32) -> (i32, i32) {
    %c0_i32 = arith.constant 0 : i32
    %c0_i32_0 = arith.constant 0 : i32
    %c0_i32_1 = arith.constant 0 : i32
    return %c0_i32, %c0_i32_0 : i32, i32
  }
  func.func @transform_5(%arg0: i32) -> (i32, i32) {
    %c0_i32 = arith.constant 0 : i32
    %c0_i32_0 = arith.constant 0 : i32
    %c0_i32_1 = arith.constant 0 : i32
    return %c0_i32, %c0_i32_0 : i32, i32
  }
  func.func @transform_6(%arg0: i32) -> (i32, i32) {
    %c0_i32 = arith.constant 0 : i32
    %c0_i32_0 = arith.constant 0 : i32
    %c0_i32_1 = arith.constant 0 : i32
    return %c0_i32, %c0_i32_0 : i32, i32
  }
  func.func @transform_7(%arg0: i32) -> (i32, i32) {
    %c0_i32 = arith.constant 0 : i32
    %c0_i32_0 = arith.constant 0 : i32
    %c0_i32_1 = arith.constant 0 : i32
    return %c0_i32, %c0_i32_0 : i32, i32
  }
  func.func @transform_8(%arg0: i32) -> (i32, i32) {
    %c0_i32 = arith.constant 0 : i32
    %c0_i32_0 = arith.constant 0 : i32
    %c0_i32_1 = arith.constant 0 : i32
    return %c0_i32, %c0_i32_0 : i32, i32
  }
  func.func @transform_9(%arg0: i32) -> (i32, i32) {
    %c0_i32 = arith.constant 0 : i32
    %c0_i32_0 = arith.constant 0 : i32
    %c0_i32_1 = arith.constant 0 : i32
    return %c0_i32, %c0_i32_0 : i32, i32
  }
  func.func @transform_10(%arg0: i32) -> (i32, i32) {
    %c0_i32 = arith.constant 0 : i32
    %c0_i32_0 = arith.constant 0 : i32
    %c0_i32_1 = arith.constant 0 : i32
    return %c0_i32, %c0_i32_0 : i32, i32
  }
  func.func @transform_11(%arg0: i32) -> (i32, i32) {
    %c0_i32 = arith.constant 0 : i32
    %c0_i32_0 = arith.constant 0 : i32
    %c0_i32_1 = arith.constant 0 : i32
    return %c0_i32, %c0_i32_0 : i32, i32
  }
  func.func @transform_12(%arg0: i32) -> (i32, i32) {
    %c0_i32 = arith.constant 0 : i32
    %c0_i32_0 = arith.constant 0 : i32
    %c0_i32_1 = arith.constant 0 : i32
    return %c0_i32, %c0_i32_0 : i32, i32
  }
  func.func @transform_13(%arg0: i32) -> (i32, i32, i32) {
    %c0_i32 = arith.constant 0 : i32
    %c0_i32_0 = arith.constant 0 : i32
    %c0_i32_1 = arith.constant 0 : i32
    return %arg0, %c0_i32, %c0_i32_0 : i32, i32, i32
  }
}

</mosaic_0001>

<bundles_post_ra>
// kernel: tpu_custom_call.1
= control target key start
LH: loop header
LB: loop body
LE: loop exit
PB: predicated region body
PF: predicated region fallthrough
CT: control target
= control target key end

     0   :  { %s2706_s0 = inlined_call_operand.vmem [shape: f32[2,8,32], index: 0, kind: input, shape index: {}]   ;;  %s2707_s1 = inlined_call_operand.vmem [shape: f32[1,32], index: 1, kind: input, shape index: {}]   ;;  %s2708_s2 = inlined_call_operand.vmem [shape: f32[1,32], index: 2, kind: input, shape index: {}]   ;;  %s2709_s3 = inlined_call_operand.vmem [shape: bf16[32,96], index: 3, kind: input, shape index: {}]   ;;  %s2710_s4 = inlined_call_operand.vmem [shape: f32[1,96], index: 4, kind: input, shape index: {}]   ;;  %s2711_s5 = inlined_call_operand.vmem [shape: bf16[32,32], index: 5, kind: input, shape index: {}]   ;;  %s2712_s6 = inlined_call_operand.vmem [shape: f32[1,32], index: 6, kind: input, shape index: {}]   ;;  %s2713_s7 = inlined_call_operand.vmem [shape: f32[1,32], index: 7, kind: input, shape index: {}]   ;;  %s2714_s8 = inlined_call_operand.vmem [shape: f32[1,32], index: 8, kind: input, shape index: {}]   ;;  %s2715_s9 = inlined_call_operand.vmem [shape: bf16[32,128], index: 9, kind: input, shape index: {}]   ;;  %s2716_s10 = inlined_call_operand.vmem [shape: f32[1,128], index: 10, kind: input, shape index: {}]   ;;  %s2717_s11 = inlined_call_operand.vmem [shape: bf16[128,32], index: 11, kind: input, shape index: {}]   ;;  %s2718_s12 = inlined_call_operand.vmem [shape: f32[1,32], index: 12, kind: input, shape index: {}]   ;;  %s2719_s13 = inlined_call_operand.hbm [shape: f32[2,8,32], index: 13, kind: output, shape index: {}]  }
   0x1   :  { %2720 = sst [smem:[#allocation5_spill]] %s2706_s0 }
   0x2   :  { %2721 = sst [smem:[#allocation6_spill]] %s2707_s1 }
   0x3   :  { %2722 = sst [smem:[#allocation7_spill]] %s2708_s2 }
   0x4   :  { %18 = vsyncpa [#allocation3], 0 }
   0x5   :  { %20 = vsyncpa [#allocation3 + $0x1], 0  ;;  %s2341_s25 = smov 0   ;;  %s2343_s26 = smov 0  }
   0x6   :  { %s2345_s27 = smov 0   ;;  %s2347_s28 = smov 0  }
   0x7 LB: > { %s2362_s29 = sadd.s32 4294967295, %s2256_s28   ;;  %s1932_s30 = sadd.s32 4294967294, %s2256_s28   ;;  %s2256_s28 = sphi %s2347_s28, %s2731_s28   ;;  %s2252_s27 = sphi %s2345_s27, %s2730_s27   ;;  %s2248_s26 = sphi %s2343_s26, %s2729_s26   ;;  %s2244_s25 = sphi %s2341_s25, %s2728_s25  }
   0x8   : > { %s2366_s14 = sadd.s32 1, %s2256_s28   ;;  %s311_s15 = sadd.s32 1, %s2252_s27 }
   0x9   : > { %s308_s16 = ssub.s32 %s2256_s28, %s2366_s14  ;;  %p321_p0 = scmp.ne.s32.totalorder %s2252_s27, %s2248_s26 }
   0xa   : > { %p309_p1 = scmp.eq.s32.totalorder %s308_s16, 0  ;;  %p322_p2 = scmp.eq.s32.totalorder %s2362_s29, 1 }
   0xb   : > { %p327_p3 = scmp.ne.s32.totalorder %s2248_s26, %s2244_s25  ;;  %p328_p4 = scmp.eq.s32.totalorder %s1932_s30, 1 }
   0xc   : > { %s2377_s17 = scalar_select %p309_p1, %s2252_s27, %s311_s15  }
   0xd   : > { %p2379_p5 = por %p322_p2, %p321_p0  ;;  %p2383_p6 = por %p328_p4, %p327_p3 }
   0xe   : > { %p1935_p7 = scmp.ge.s32.totalorder %s2256_s28, 1  ;;  %p389_p8 = scmp.lt.s32.totalorder %s2256_s28, 3 }
  0x10   : > { %p390_p9 = pnand %p1935_p7, %p389_p8 }
  0x11   : > { %p432_p10 = scmp.lt.s32.totalorder (!%p390_p9), %s2362_s29, 1  ;;  %vm440_vm0 = vcmask (!%p390_p9), 261120   ;;  %s2725_s0 = sld [smem:[#allocation5_spill]] (!%p390_p9)  ;;  %v2160_v7 = vld [vmem:[%s2709_s3] sm:$0xff] (!%p390_p9)   ;;  %v2258_v8 = vmov (!%p390_p9), 0.0   ;;  %vm2259_vm1 = vmmov (!%p390_p9), 0   ;;  %v552_v33 = vlaneseq (!%p390_p9) }
  0x12   : > { %393 = sbr.rel (%p390_p9) target bundleno = 2593 (0xa21), region = 72  ;;  %2017 = vmatprep.subr.bf16.mxu0 (!%p390_p9), %v2258_v8  ;;  %2021 = vmatprep.mubr.msk.bf16.mxu0 (!%p390_p9), %vm2259_vm1, %v2258_v8  ;;  %v2161_v9 = vld [vmem:[%s2709_s3 + $0x8] sm:$0xff] (!%p390_p9)   ;;  %s2726_s1 = sld [smem:[#allocation6_spill]] (!%p390_p9)  ;;  %v1940_v20 = vld [vmem:[%s2710_s4] ss:$0 sm:$0xff] (!%p390_p9)  ;;  %vm998_vm2 = vcmask (!%p390_p9), 64512  }
  0x13   : > { %2018 = vmatpush3.bf16.msra.mxu0 (!%p390_p9), %v2160_v7  ;;  %2037 = vmatprep.subr.bf16.mxu1 (!%p390_p9), %v2258_v8  ;;  %s2727_s2 = sld [smem:[#allocation7_spill]] (!%p390_p9)  ;;  %s2260_s16 = smov (!%p390_p9), 104   ;;  %v2265_v31 = vmov (!%p390_p9), 1983009808   ;;  %v2266_v35 = vmov (!%p390_p9), 1934713408  }
  0x14   : > { %2019 = vmatprep.subr.bf16.mxu0 (!%p390_p9), %v2258_v8  ;;  %2039 = vmatprep.mubr.msk.bf16.mxu1 (!%p390_p9), %vm2259_vm1, %v2258_v8  ;;  %s2263_s22 = smov (!%p390_p9), 96   ;;  %s2264_s23 = smov (!%p390_p9), 64   ;;  %v550_v32 = vunpack.c.l.s4 (!%p390_p9), %v2265_v31  ;;  %v582_v36 = vunpack.c.l.s4 (!%p390_p9), %v2266_v35  ;;  %v2440_v38 = vshrl.u32 (!%p390_p9), %v552_v33, 7  ;;  %vm1237_vm4 = vcmask (!%p390_p9), 1043456  }
  0x15   : > { %vm1576_vm5 = vcmask (!%p390_p9), 130048   ;;  %vm1578_vm6 = vcmask (!%p390_p9), 195584  }
  0x16   : > { %v551_v37 = vunpack.c.0.s8 (!%p390_p9), %v550_v32  ;;  %v583_v40 = vunpack.c.0.s8 (!%p390_p9), %v582_v36 }
  0x17   : > { %2020 = vmatpush3.bf16.msra.mxu0 (!%p390_p9), %v2161_v9 }
  0x18   : > { %2025 = vmatprep.subr.bf16.mxu0 (!%p390_p9), %v2258_v8  ;;  %v1938_v14 = vld [vmem:[%s2726_s1] ss:$0 sm:$0xff] (!%p390_p9)  ;;  %v2443_v41 = vsub.s32 (!%p390_p9), %v551_v37, %v2440_v38  ;;  %v2446_v47 = vsub.s32 (!%p390_p9), %v583_v40, %v2440_v38 }
  0x19   : > { %s433_s20 = scalar_select %p432_p10, %s2362_s29, 1  ;;  %v1939_v16 = vld [vmem:[%s2727_s2] ss:$0 sm:$0xff] }
  0x1b   : > { %s1937_s21 = sshll.u32 %s433_s20, 3  ;;  %s2261_s20 = smov 120  }
  0x1c   : > { %s435_s24 = scalar_lea.vmem %s2725_s0, %s1937_s21  ;;  %s2262_s21 = smov 112  }
  0x1d   : > { %v2394_v0 = vld [vmem:[%s435_s24] sm:$0xff] }
  0x1e   : > { %v441_v1 = vsel %vm440_vm0, %v2394_v0, 0.0 }
  0x1f   : > { %442 = vadd.xlane.f32.xlu0 %v441_v1 }
  0xac   : > { %v443_v2 = vpop.xlane.xlu0 %442 }
  0xad   : > { %v445_v3 = vmul.f32 0.03125, %v443_v2 }
  0xaf   : > { %v446_v4 = vsub.f32 %v2394_v0, %v445_v3 }
  0xb1   : > { %v447_v5 = vmul.f32 %v446_v4, %v446_v4 }
  0xb3   : > { %v448_v6 = vsel %vm440_vm0, %v447_v5, 0.0 }
  0xb4   : > { %449 = vadd.xlane.f32.xlu0 %v448_v6 }
 0x141   : > { %v450_v10 = vpop.xlane.xlu0 %449 }
 0x142   : > { %v451_v11 = vmul.f32 0.03125, %v450_v10 }
 0x144   : > { %v452_v12 = vadd.f32 1e-05, %v451_v11 }
 0x146   : > { %2174 = vrsqrt.f32 %v452_v12 }
 0x150   : > { %v2175_v13 = vpop.eup %2174 }
 0x151   : > { %v454_v15 = vmul.f32 %v2175_v13, %v446_v4 }
 0x153   : > { %v461_v17 = vmul.f32 %v1938_v14, %v454_v15 }
 0x155   : > { %v468_v18 = vadd.f32 %v1939_v16, %v461_v17 }
 0x157   : > { %v469_v19 = vpack.c.bf16 %v468_v18, %v468_v18 }
 0x159   : > { %2022 = vmatmul.mubr.msk.bf16.vlgmr.msra.gmra.mrb[0].mxu0 %vm440_vm0, %v469_v19 }
 0x15a   : > { %2027 = vmatprep.mubr.msk.bf16.mxu0 %vm2259_vm1, %v2258_v8 }
 0x22c   : > { %v530_v21 = vpop.f32.mrb[0].mxu0 }
 0x22d   : > { %v531_v22 = vadd.f32 %v1940_v20, %v530_v21  ;;  %v2023_v23 = vpop.f32.mrb[1].mxu0 }
 0x22e   : > { %v533_v24 = vpop.f32.mrb[2].mxu0 }
 0x22f   : > { %692 = vrot.lane.b32.xlu0 %v531_v22, %s2260_s16  ;;  %688 = vrot.lane.b32.xlu1 %v531_v22, %s2261_s20  ;;  %v2024_v25 = vpop.f32.mrb[3].mxu0  ;;  %v2426_v26 = vmul.f32 0.35355338, %v531_v22 }
 0x233   : > { %690 = vrot.lane.b32.xlu1 %v531_v22, %s2262_s21  ;;  %544 = vrot.lane.b32.xlu0 %v2426_v26, %s2260_s16  ;;  %s429_s16 = sand.u32 1, %s2248_s26  }
 0x237   : > { %694 = vrot.lane.b32.xlu1 %v531_v22, %s2263_s22  ;;  %846 = vrot.lane.b32.xlu0 %v531_v22, %s2264_s23 }
 0x2a1   : > { %v689_v27 = vpop.permute.xlu1 %688  ;;  %v2433_v29 = vpop.permute.xlu0 %692 }
 0x2a2   : > { %696 = vrot.lane.b32.xlu1 %v689_v27, %s2263_s22 }
 0x2a5   : > { %v2430_v28 = vpop.permute.xlu1 %690  ;;  %v545_v57 = vpop.permute.xlu0 %544 }
 0x2a6   : > { %698 = vrot.lane.b32.xlu1 %v2430_v28, %s2263_s22 }
 0x2a9   : > { %v695_v30 = vpop.permute.xlu1 %694 }
 0x2aa   : > { %700 = vrot.lane.b32.xlu1 %v2433_v29, %s2263_s22  ;;  %s2269_s22 = smov 24  }
 0x2ae   : > { %538 = vrot.lane.b32.xlu1 %v2426_v26, %s2261_s20  ;;  %s2267_s20 = smov 16  }
 0x2b2   : > { %541 = vrot.lane.b32.xlu1 %v2426_v26, %s2262_s21  ;;  %s2268_s21 = smov 8  }
 0x2b6   : > { %848 = vrot.lane.b32.xlu1 %v689_v27, %s2264_s23 }
 0x314   : > { %v697_v34 = vpop.permute.xlu1 %696 }
 0x318   : > { %v699_v39 = vpop.permute.xlu1 %698 }
 0x319   : > { %v706_v42 = vcombine.low %v695_v30, %v699_v39  ;;  %v707_v43 = vcombine.high %v695_v30, %v699_v39 }
 0x31b   : > { %v714_v48 = vrot.slane %v706_v42, %v2443_v41  ;;  %v721_v49 = vrot.slane %v707_v43, %v2443_v41 }
 0x31c   : > { %v701_v44 = vpop.permute.xlu1 %700 }
 0x31d   : > { %v722_v45 = vcombine.low %v697_v34, %v701_v44  ;;  %v723_v46 = vcombine.high %v697_v34, %v701_v44 }
 0x31f   : > { %v730_v50 = vrot.slane %v722_v45, %v2443_v41  ;;  %v737_v51 = vrot.slane %v723_v46, %v2443_v41 }
 0x320   : > { %v539_v52 = vpop.permute.xlu1 %538 }
 0x321   : > { %v738_v53 = vcombine.low %v714_v48, %v730_v50  ;;  %v739_v54 = vcombine.high %v714_v48, %v730_v50  ;;  %v754_v55 = vcombine.low %v721_v49, %v737_v51  ;;  %v755_v56 = vcombine.high %v721_v49, %v737_v51 }
 0x322   : > { %v563_v62 = vcombine.low %v539_v52, %v545_v57  ;;  %v564_v63 = vcombine.high %v539_v52, %v545_v57 }
 0x323   : > { %v746_v58 = vrot.slane %v738_v53, %v2446_v47  ;;  %v753_v59 = vrot.slane %v739_v54, %v2446_v47  ;;  %v762_v60 = vrot.slane %v754_v55, %v2446_v47  ;;  %v769_v61 = vrot.slane %v755_v56, %v2446_v47 }
 0x324   : > { %v542_v1 = vpop.permute.xlu1 %541  ;;  %v571_v13 = vrot.slane %v563_v62, %v2443_v41  ;;  %v578_v14 = vrot.slane %v564_v63, %v2443_v41 }
 0x325   : > { %v774_v2 = vcombine.low %v746_v58, %v753_v59  ;;  %v1946_v3 = vcombine.high %v746_v58, %v753_v59  ;;  %v790_v4 = vcombine.low %v762_v60, %v769_v61  ;;  %v1947_v5 = vcombine.high %v762_v60, %v769_v61 }
 0x326   : > { %v547_v6 = vcombine.low %v2426_v26, %v542_v1  ;;  %v548_v7 = vcombine.high %v2426_v26, %v542_v1 }
 0x327   : > { %v781_v9 = vrot.slane %v774_v2, %v2443_v41  ;;  %v789_v10 = vrot.slane %v1946_v3, %v2443_v41  ;;  %v797_v11 = vrot.slane %v790_v4, %v2443_v41  ;;  %v805_v12 = vrot.slane %v1947_v5, %v2443_v41 }
 0x328   : > { %v555_v15 = vrot.slane %v547_v6, %v2443_v41  ;;  %v562_v16 = vrot.slane %v548_v7, %v2443_v41 }
 0x329   : > { %v806_v17 = vcombine.low %v781_v9, %v789_v10  ;;  %v822_v18 = vcombine.low %v797_v11, %v805_v12  ;;  %v807_v19 = vcombine.high %v781_v9, %v789_v10  ;;  %v823_v20 = vcombine.high %v797_v11, %v805_v12 }
 0x32a   : > { %v579_v21 = vcombine.low %v555_v15, %v571_v13  ;;  %v580_v22 = vcombine.high %v555_v15, %v571_v13  ;;  %v595_v23 = vcombine.low %v562_v16, %v578_v14  ;;  %v596_v24 = vcombine.high %v562_v16, %v578_v14 }
 0x32b   : > { %v814_v25 = vrot.slane %v806_v17, %v2446_v47  ;;  %v830_v26 = vrot.slane %v822_v18, %v2446_v47  ;;  %v821_v27 = vrot.slane %v807_v19, %v2446_v47  ;;  %v837_v30 = vrot.slane %v823_v20, %v2446_v47 }
 0x32c   : > { %v587_v31 = vrot.slane %v579_v21, %v2446_v47  ;;  %v594_v32 = vrot.slane %v580_v22, %v2446_v47  ;;  %v603_v34 = vrot.slane %v595_v23, %v2446_v47  ;;  %v610_v35 = vrot.slane %v596_v24, %v2446_v47 }
 0x32d   : > { %v838_v36 = vcombine.low %v814_v25, %v830_v26  ;;  %v840_v37 = vcombine.low %v821_v27, %v837_v30  ;;  %v839_v53 = vcombine.high %v814_v25, %v830_v26  ;;  %v841_v5 = vcombine.high %v821_v27, %v837_v30 }
 0x32e   : > { %v615_v39 = vcombine.low %v587_v31, %v594_v32  ;;  %v1944_v40 = vcombine.high %v587_v31, %v594_v32  ;;  %v631_v42 = vcombine.low %v603_v34, %v610_v35  ;;  %v1945_v43 = vcombine.high %v603_v34, %v610_v35 }
 0x32f   : > { %v842_v44 = vpack.c.bf16 %v838_v36, %v838_v36  ;;  %v844_v45 = vpack.c.bf16 %v840_v37, %v840_v37  ;;  %v843_v63 = vpack.c.bf16 %v839_v53, %v839_v53  ;;  %v845_v7 = vpack.c.bf16 %v841_v5, %v841_v5 }
 0x330   : > { %v622_v46 = vrot.slane %v615_v39, %v2443_v41  ;;  %v630_v48 = vrot.slane %v1944_v40, %v2443_v41  ;;  %v638_v49 = vrot.slane %v631_v42, %v2443_v41  ;;  %v646_v50 = vrot.slane %v1945_v43, %v2443_v41 }
 0x331   : > { %v1003_v51 = vsel %vm998_vm2, %v842_v44, 0  ;;  %v1095_v52 = vsel %vm998_vm2, %v844_v45, 0  ;;  %v1049_v4 = vsel %vm998_vm2, %v843_v63, 0  ;;  %v1141_v10 = vsel %vm998_vm2, %v845_v7, 0  ;;  %v847_v44 = vpop.permute.xlu0 %846 }
 0x332   : > { %v647_v54 = vcombine.low %v622_v46, %v630_v48  ;;  %v663_v55 = vcombine.low %v638_v49, %v646_v50  ;;  %2026 = vmatpush3.bf16.xpose.msra.mxu0 %v1003_v51  ;;  %2038 = vmatpush3.bf16.xpose.msra.mxu1 %v1095_v52  ;;  %v648_v56 = vcombine.high %v622_v46, %v630_v48  ;;  %v1186_v13 = vand.u32 127, %v552_v33 }
 0x333   : > { %2031 = vmatprep.subr.bf16.mxu0 %v2258_v8  ;;  %v664_v57 = vcombine.high %v638_v49, %v646_v50  ;;  %2049 = vmatprep.subr.bf16.mxu1 %v2258_v8 }
 0x334   : > { %v655_v58 = vrot.slane %v647_v54, %v2446_v47  ;;  %v671_v59 = vrot.slane %v663_v55, %v2446_v47  ;;  %v662_v60 = vrot.slane %v648_v56, %v2446_v47  ;;  %vm1187_vm3 = vcmp.le.s32.totalorder %v1186_v13, %v2440_v38 }
 0x335   : > { %v678_v61 = vrot.slane %v664_v57, %v2446_v47 }
 0x336   : > { %v679_v62 = vcombine.low %v655_v58, %v671_v59  ;;  %v680_v6 = vcombine.high %v655_v58, %v671_v59 }
 0x337   : > { %v681_v1 = vcombine.low %v662_v60, %v678_v61  ;;  %v682_v11 = vcombine.high %v662_v60, %v678_v61 }
 0x338   : > { %v683_v2 = vpack.c.bf16 %v679_v62, %v679_v62  ;;  %v684_v9 = vpack.c.bf16 %v680_v6, %v680_v6 }
 0x339   : > { %v685_v3 = vpack.c.bf16 %v681_v1, %v681_v1  ;;  %v686_v12 = vpack.c.bf16 %v682_v11, %v682_v11 }
 0x33a   : > { %2028 = vmatmul.mubr.msk.bf16.vlgmr.msra.gmra.mrb[4].mxu0 %vm998_vm2, %v683_v2 }
 0x33b   : > { %2040 = vmatmul.mubr.msk.bf16.vlgmr.msra.gmra.mrb[0].mxu1 %vm998_vm2, %v685_v3  ;;  %2032 = vmatpush3.bf16.xpose.msra.mxu0 %v1049_v4 }
 0x33c   : > { %2033 = vmatprep.mubr.msk.bf16.mxu0 %vm2259_vm1, %v2258_v8  ;;  %2043 = vmatprep.subr.bf16.mxu0 %v2258_v8 }
 0x33d   : > { %2051 = vmatprep.mubr.msk.bf16.mxu1 %vm2259_vm1, %v2258_v8 }
 0x342   : > { %2034 = vmatmul.mubr.msk.bf16.vlgmr.msra.gmra.mrb[8].mxu0 %vm998_vm2, %v684_v9 }
 0x343   : > { %2044 = vmatpush3.bf16.xpose.msra.mxu0 %v1141_v10  ;;  %2045 = vmatprep.mubr.msk.bf16.mxu0 %vm2259_vm1, %v2258_v8 }
 0x344   : > { %2055 = vmatprep.subr.bf16.mxu0 %v2258_v8 }
 0x34a   : > { %2046 = vmatmul.mubr.msk.bf16.vlgmr.msra.gmra.mrb[12].mxu0 %vm998_vm2, %v686_v12 }
 0x34b   : > { %2057 = vmatprep.mubr.msk.bf16.mxu0 %vm2259_vm1, %v2258_v8 }
 0x40d   : > { %v1039_v14 = vpop.f32.mrb[4].mxu0 }
 0x40e   : > { %v1190_v15 = vsel %vm1187_vm3, %v1039_v14, -1e+30  ;;  %v1131_v16 = vpop.f32.mrb[0].mxu1  ;;  %v2029_v17 = vpop.f32.mrb[5].mxu0 }
 0x40f   : > { %v2041_v18 = vpop.f32.mrb[1].mxu1  ;;  %v1042_v19 = vpop.f32.mrb[6].mxu0  ;;  %v1194_v20 = vsel %vm998_vm2, %v1190_v15, -inf  ;;  %v2516_v36 = vsel %vm1187_vm3, %v1131_v16, -1e+30 }
 0x410   : > { %v1134_v21 = vpop.f32.mrb[2].mxu1  ;;  %1195 = vmax.xlane.f32.xlu1 %v1194_v20  ;;  %v2030_v22 = vpop.f32.mrb[7].mxu0  ;;  %v1200_v37 = vsel %vm998_vm2, %v2516_v36, -inf }
 0x411   : > { %v2042_v23 = vpop.f32.mrb[3].mxu1 }
 0x415   : > { %v1085_v24 = vpop.f32.mrb[8].mxu0 }
 0x416   : > { %v1191_v33 = vsel %vm1187_vm3, %v1085_v24, -1e+30  ;;  %v2035_v25 = vpop.f32.mrb[9].mxu0 }
 0x417   : > { %v1088_v26 = vpop.f32.mrb[10].mxu0  ;;  %v1197_v27 = vsel %vm998_vm2, %v1191_v33, -inf }
 0x418   : > { %1198 = vmax.xlane.f32.xlu0 %v1197_v27  ;;  %v2036_v30 = vpop.f32.mrb[11].mxu0 }
 0x41d   : > { %v1177_v31 = vpop.f32.mrb[12].mxu0 }
 0x41e   : > { %v2047_v32 = vpop.f32.mrb[13].mxu0  ;;  %v2522_v39 = vsel %vm1187_vm3, %v1177_v31, -1e+30 }
 0x41f   : > { %v1180_v34 = vpop.f32.mrb[14].mxu0  ;;  %v1203_v40 = vsel %vm998_vm2, %v2522_v39, -inf }
 0x420   : > { %v2048_v35 = vpop.f32.mrb[15].mxu0 }
 0x421   : > { %850 = vrot.lane.b32.xlu1 %v2430_v28, %s2264_s23  ;;  %v849_v28 = vpop.permute.xlu1 %848 }
 0x42e   : > { %852 = vrot.lane.b32.xlu0 %v2433_v29, %s2264_s23  ;;  %s1980_s23 = sshll.u32 %s2362_s29, 7  ;;  %s1860_s29 = scalar_lea.sflag [#allocation3], %s429_s16 }
 0x42f   : > { %s2663_s1 = scalar_lea.hbm %s2719_s13, %s1980_s23 }
 0x445   : > { %1201 = vmax.xlane.f32.xlu1 %v1200_v37 }
 0x44d   : > { %1204 = vmax.xlane.f32.xlu0 %v1203_v40 }
 0x49d   : > { %v1196_v42 = vpop.xlane.xlu1 %1195 }
 0x49e   : > { %v1206_v43 = vsub.f32 %v1190_v15, %v1196_v42 }
 0x4a0   : > { %v1210_v29 = vmul.f32 1.442695, %v1206_v43 }
 0x4a1   : > { %v851_v45 = vpop.permute.xlu1 %850 }
 0x4a2   : > { %2176 = vpow2.f32 %v1210_v29  ;;  %v858_v49 = vcombine.low %v847_v44, %v851_v45  ;;  %v859_v50 = vcombine.high %v847_v44, %v851_v45 }
 0x4a4   : > { %v866_v55 = vrot.slane %v858_v49, %v2443_v41  ;;  %v873_v56 = vrot.slane %v859_v50, %v2443_v41 }
 0x4a5   : > { %v1199_v46 = vpop.xlane.xlu0 %1198 }
 0x4a6   : > { %v1207_v48 = vsub.f32 %v1191_v33, %v1199_v46 }
 0x4a8   : > { %v1212_v51 = vmul.f32 1.442695, %v1207_v48 }
 0x4a9   : > { %v853_v52 = vpop.permute.xlu0 %852 }
 0x4aa   : > { %2178 = vpow2.f32 %v1212_v51  ;;  %v874_v38 = vcombine.low %v849_v28, %v853_v52  ;;  %v875_v53 = vcombine.high %v849_v28, %v853_v52 }
 0x4ac   : > { %v2177_v54 = vpop.eup %2176  ;;  %v882_v57 = vrot.slane %v874_v38, %v2443_v41  ;;  %v889_v58 = vrot.slane %v875_v53, %v2443_v41 }
 0x4ad   : > { %v1218_v59 = vsel %vm998_vm2, %v2177_v54, 0.0  ;;  %v1230_v37 = vpack.c.bf16 %v2177_v54, %v2177_v54 }
 0x4ae   : > { %v890_v60 = vcombine.low %v866_v55, %v882_v57  ;;  %v891_v61 = vcombine.high %v866_v55, %v882_v57  ;;  %v906_v62 = vcombine.low %v873_v56, %v889_v58  ;;  %v907_v63 = vcombine.high %v873_v56, %v889_v58  ;;  %1219 = vadd.xlane.f32.xlu0 %v1218_v59 }
 0x4b0   : > { %v898_v1 = vrot.slane %v890_v60, %v2446_v47  ;;  %v905_v2 = vrot.slane %v891_v61, %v2446_v47  ;;  %v914_v3 = vrot.slane %v906_v62, %v2446_v47  ;;  %v921_v4 = vrot.slane %v907_v63, %v2446_v47 }
 0x4b2   : > { %v926_v5 = vcombine.low %v898_v1, %v905_v2  ;;  %v1948_v6 = vcombine.high %v898_v1, %v905_v2  ;;  %v942_v7 = vcombine.low %v914_v3, %v921_v4  ;;  %v1949_v9 = vcombine.high %v914_v3, %v921_v4 }
 0x4b4   : > { %v2179_v10 = vpop.eup %2178  ;;  %v933_v11 = vrot.slane %v926_v5, %v2443_v41  ;;  %v941_v12 = vrot.slane %v1948_v6, %v2443_v41  ;;  %v949_v13 = vrot.slane %v942_v7, %v2443_v41  ;;  %v957_v14 = vrot.slane %v1949_v9, %v2443_v41 }
 0x4b5   : > { %v1221_v15 = vsel %vm998_vm2, %v2179_v10, 0.0  ;;  %v1231_v40 = vpack.c.bf16 %v2179_v10, %v2179_v10 }
 0x4b6   : > { %1222 = vadd.xlane.f32.xlu1 %v1221_v15  ;;  %v958_v16 = vcombine.low %v933_v11, %v941_v12  ;;  %v974_v17 = vcombine.low %v949_v13, %v957_v14  ;;  %v959_v18 = vcombine.high %v933_v11, %v941_v12  ;;  %v975_v19 = vcombine.high %v949_v13, %v957_v14 }
 0x4b8   : > { %v966_v20 = vrot.slane %v958_v16, %v2446_v47  ;;  %v982_v21 = vrot.slane %v974_v17, %v2446_v47  ;;  %v973_v22 = vrot.slane %v959_v18, %v2446_v47  ;;  %v989_v23 = vrot.slane %v975_v19, %v2446_v47 }
 0x4ba   : > { %v990_v24 = vcombine.low %v966_v20, %v982_v21  ;;  %v991_v33 = vcombine.high %v966_v20, %v982_v21  ;;  %v992_v25 = vcombine.low %v973_v22, %v989_v23  ;;  %v993_v26 = vcombine.high %v973_v22, %v989_v23 }
 0x4bc   : > { %v994_v27 = vpack.c.bf16 %v990_v24, %v990_v24  ;;  %v995_v30 = vpack.c.bf16 %v991_v33, %v991_v33  ;;  %v996_v34 = vpack.c.bf16 %v992_v25, %v992_v25  ;;  %v997_v35 = vpack.c.bf16 %v993_v26, %v993_v26 }
 0x4be   : > { %v1239_v31 = vsel %vm1237_vm4, %v994_v27, 0  ;;  %v1285_v32 = vsel %vm1237_vm4, %v995_v30, 0  ;;  %v1331_v28 = vsel %vm1237_vm4, %v996_v34, 0  ;;  %v1377_v42 = vsel %vm1237_vm4, %v997_v35, 0 }
 0x4bf   : > { %2050 = vmatpush3.bf16.msra.mxu1 %v1239_v31  ;;  %2056 = vmatpush3.bf16.msra.mxu0 %v1285_v32  ;;  %v2162_v31 = vld [vmem:[%s2711_s5] sm:$0xff]  }
 0x4c0   : > { %2061 = vmatprep.subr.bf16.mxu1 %v2258_v8  ;;  %2067 = vmatprep.subr.bf16.mxu0 %v2258_v8 }
 0x4c2   : > { %2052 = vmatmul.mubr.msk.bf16.vlgmr.msra.gmra.mrb[4].mxu1 %vm998_vm2, %v1230_v37  ;;  %2058 = vmatmul.mubr.msk.bf16.vlgmr.msra.gmra.mrb[16].mxu0 %vm998_vm2, %v1231_v40 }
 0x4c3   : > { %2062 = vmatpush3.bf16.msra.mxu1 %v1331_v28  ;;  %2068 = vmatpush3.bf16.msra.mxu0 %v1377_v42 }
 0x4c4   : > { %2063 = vmatprep.mubr.msk.bf16.mxu1 %vm2259_vm1, %v2258_v8  ;;  %2069 = vmatprep.mubr.msk.bf16.mxu0 %vm2259_vm1, %v2258_v8 }
 0x4c5   : > { %2073 = vmatprep.subr.bf16.mxu1 %v2258_v8  ;;  %2081 = vmatprep.subr.bf16.mxu0 %v2258_v8 }
 0x4d2   : > { %v1202_v43 = vpop.xlane.xlu1 %1201 }
 0x4d3   : > { %v1208_v29 = vsub.f32 %v2516_v36, %v1202_v43 }
 0x4d5   : > { %v1214_v44 = vmul.f32 1.442695, %v1208_v29  ;;  %v2163_v29 = vld [vmem:[%s2711_s5 + $0x8] sm:$0xff]  }
 0x4d7   : > { %2180 = vpow2.f32 %v1214_v44 }
 0x4da   : > { %v1205_v45 = vpop.xlane.xlu0 %1204 }
 0x4db   : > { %v1209_v46 = vsub.f32 %v2522_v39, %v1205_v45 }
 0x4dd   : > { %v1216_v48 = vmul.f32 1.442695, %v1209_v46 }
 0x4df   : > { %2182 = vpow2.f32 %v1216_v48 }
 0x4e1   : > { %v2181_v49 = vpop.eup %2180 }
 0x4e2   : > { %v1224_v50 = vsel %vm998_vm2, %v2181_v49, 0.0  ;;  %v1232_v51 = vpack.c.bf16 %v2181_v49, %v2181_v49 }
 0x4e3   : > { %1225 = vadd.xlane.f32.xlu0 %v1224_v50 }
 0x4e4   : > { %2064 = vmatmul.mubr.msk.bf16.vlgmr.msra.gmra.mrb[8].mxu1 %vm998_vm2, %v1232_v51 }
 0x4e5   : > { %2077 = vmatprep.mubr.msk.bf16.mxu1 %vm2259_vm1, %v2258_v8  ;;  %2074 = vmatpush3.bf16.msra.mxu1 %v2162_v31 }
 0x4e6   : > { %2075 = vmatprep.subr.bf16.mxu1 %v2258_v8 }
 0x4e9   : > { %v2183_v52 = vpop.eup %2182  ;;  %2076 = vmatpush3.bf16.msra.mxu1 %v2163_v29 }
 0x4ea   : > { %v1227_v36 = vsel %vm998_vm2, %v2183_v52, 0.0  ;;  %v1233_v38 = vpack.c.bf16 %v2183_v52, %v2183_v52  ;;  %2089 = vmatprep.subr.bf16.mxu1 %v2258_v8 }
 0x4eb   : > { %1228 = vadd.xlane.f32.xlu1 %v1227_v36 }
 0x4ec   : > { %2070 = vmatmul.mubr.msk.bf16.vlgmr.msra.gmra.mrb[20].mxu0 %vm998_vm2, %v1233_v38 }
 0x4ed   : > { %2085 = vmatprep.mubr.msk.bf16.mxu0 %vm2259_vm1, %v2258_v8 }
 0x53b   : > { %v1220_v60 = vpop.xlane.xlu0 %1219 }
 0x53c   : > { %2184 = vrcp.f32 %v1220_v60 }
 0x543   : > { %v1223_v62 = vpop.xlane.xlu1 %1222 }
 0x546   : > { %v2185_v1 = vpop.eup %2184 }
 0x570   : > { %v1226_v61 = vpop.xlane.xlu0 %1225 }
 0x571   : > { %2186 = vrcp.f32 %v1226_v61 }
 0x572   : > { %2188 = vrcp.f32 %v1223_v62 }
 0x578   : > { %v1229_v63 = vpop.xlane.xlu1 %1228 }
 0x579   : > { %2190 = vrcp.f32 %v1229_v63  ;;  %v1960_v63 = vld [vmem:[%s2712_s6] ss:$0 sm:$0xff] }
 0x57b   : > { %v2187_v2 = vpop.eup %2186 }
 0x57c   : > { %v2189_v12 = vpop.eup %2188 }
 0x583   : > { %v2191_v13 = vpop.eup %2190 }
 0x595   : > { %v1275_v39 = vpop.f32.mrb[4].mxu1  ;;  %v1321_v53 = vpop.f32.mrb[16].mxu0 }
 0x596   : > { %v2053_v54 = vpop.f32.mrb[5].mxu1  ;;  %v2059_v55 = vpop.f32.mrb[17].mxu0  ;;  %v1420_v4 = vmul.f32 %v2185_v1, %v1275_v39  ;;  %v1422_v15 = vmul.f32 %v2189_v12, %v1321_v53 }
 0x597   : > { %v1278_v56 = vpop.f32.mrb[6].mxu1  ;;  %v1324_v57 = vpop.f32.mrb[18].mxu0 }
 0x598   : > { %v2054_v58 = vpop.f32.mrb[7].mxu1  ;;  %v2060_v59 = vpop.f32.mrb[19].mxu0 }
 0x5b7   : > { %v1367_v3 = vpop.f32.mrb[8].mxu1 }
 0x5b8   : > { %v1424_v5 = vmul.f32 %v2187_v2, %v1367_v3  ;;  %v2065_v6 = vpop.f32.mrb[9].mxu1 }
 0x5b9   : > { %v1370_v7 = vpop.f32.mrb[10].mxu1 }
 0x5ba   : > { %v1427_v9 = vcombine.low %v1420_v4, %v1424_v5  ;;  %v1428_v10 = vcombine.high %v1420_v4, %v1424_v5  ;;  %v2066_v11 = vpop.f32.mrb[11].mxu1 }
 0x5bc   : > { %v1435_v22 = vrot.slane %v1427_v9, %v2443_v41  ;;  %v1442_v23 = vrot.slane %v1428_v10, %v2443_v41 }
 0x5bf   : > { %v1413_v14 = vpop.f32.mrb[20].mxu0 }
 0x5c0   : > { %v1426_v16 = vmul.f32 %v2191_v13, %v1413_v14  ;;  %v2071_v17 = vpop.f32.mrb[21].mxu0  ;;  %v2164_v14 = vld [vmem:[%s2715_s9] sm:$0xff]  }
 0x5c1   : > { %v1416_v18 = vpop.f32.mrb[22].mxu0  ;;  %2082 = vmatpush3.bf16.msra.mxu0 %v2164_v14  ;;  %v2168_v17 = vld [vmem:[%s2717_s11 + $0x10] sm:$0xff]  }
 0x5c2   : > { %v1443_v19 = vcombine.low %v1422_v15, %v1426_v16  ;;  %v1444_v20 = vcombine.high %v1422_v15, %v1426_v16  ;;  %v2072_v21 = vpop.f32.mrb[23].mxu0  ;;  %2083 = vmatprep.subr.bf16.mxu0 %v2258_v8  ;;  %v2166_v15 = vld [vmem:[%s2717_s11] sm:$0xff]   ;;  %v2167_v16 = vld [vmem:[%s2717_s11 + $0x8] sm:$0xff]   ;;  %v2169_v18 = vld [vmem:[%s2717_s11 + $0x18] sm:$0xff]  }
 0x5c4   : > { %v1451_v24 = vrot.slane %v1443_v19, %v2443_v41  ;;  %v1458_v33 = vrot.slane %v1444_v20, %v2443_v41  ;;  %v2170_v19 = vld [vmem:[%s2717_s11 + $0x20] sm:$0xff]   ;;  %v2171_v20 = vld [vmem:[%s2717_s11 + $0x28] sm:$0xff]  }
 0x5c6   : > { %v1459_v25 = vcombine.low %v1435_v22, %v1451_v24  ;;  %v1460_v26 = vcombine.high %v1435_v22, %v1451_v24  ;;  %v1475_v27 = vcombine.low %v1442_v23, %v1458_v33  ;;  %v1476_v30 = vcombine.high %v1442_v23, %v1458_v33  ;;  %v1964_v33 = vld [vmem:[%s2713_s7] ss:$0 sm:$0xff] }
 0x5c8   : > { %v1467_v32 = vrot.slane %v1459_v25, %v2446_v47  ;;  %v1474_v34 = vrot.slane %v1460_v26, %v2446_v47  ;;  %v1483_v35 = vrot.slane %v1475_v27, %v2446_v47  ;;  %v1490_v37 = vrot.slane %v1476_v30, %v2446_v47  ;;  %v1965_v26 = vld [vmem:[%s2714_s8] ss:$0 sm:$0xff] }
 0x5ca   : > { %v1495_v40 = vcombine.low %v1467_v32, %v1474_v34  ;;  %v1958_v28 = vcombine.high %v1467_v32, %v1474_v34  ;;  %v1511_v42 = vcombine.low %v1483_v35, %v1490_v37  ;;  %v1959_v43 = vcombine.high %v1483_v35, %v1490_v37  ;;  %v2172_v32 = vld [vmem:[%s2717_s11 + $0x30] sm:$0xff]   ;;  %v2173_v34 = vld [vmem:[%s2717_s11 + $0x38] sm:$0xff]   ;;  %v1966_v35 = vld [vmem:[%s2716_s10] ss:$0 sm:$0xff] }
 0x5cc   : > { %v1502_v44 = vrot.slane %v1495_v40, %v2443_v41  ;;  %v1510_v45 = vrot.slane %v1958_v28, %v2443_v41  ;;  %v1518_v46 = vrot.slane %v1511_v42, %v2443_v41  ;;  %v1526_v48 = vrot.slane %v1959_v43, %v2443_v41 }
 0x5ce   : > { %v1528_v49 = vcombine.high %v1502_v44, %v1510_v45  ;;  %v1544_v50 = vcombine.high %v1518_v46, %v1526_v48  ;;  %v1527_v51 = vcombine.low %v1502_v44, %v1510_v45  ;;  %v1543_v52 = vcombine.low %v1518_v46, %v1526_v48 }
 0x5d0   : > { %v1542_v36 = vrot.slane %v1528_v49, %v2446_v47  ;;  %v1558_v38 = vrot.slane %v1544_v50, %v2446_v47  ;;  %v1535_v39 = vrot.slane %v1527_v51, %v2446_v47  ;;  %v1551_v53 = vrot.slane %v1543_v52, %v2446_v47 }
 0x5d2   : > { %v1561_v54 = vcombine.low %v1542_v36, %v1558_v38  ;;  %v1560_v55 = vcombine.high %v1535_v39, %v1551_v53  ;;  %v1562_v56 = vcombine.high %v1542_v36, %v1558_v38  ;;  %v1559_v57 = vcombine.low %v1535_v39, %v1551_v53 }
 0x5d4   : > { %1568 = vrot.lane.b32.xlu1 %v1561_v54, %s2267_s20  ;;  %1564 = vrot.lane.b32.xlu0 %v1560_v55, %s2268_s21  ;;  %s1936_s20 = sshll.u32 %s429_s16, 3  ;;  %s2270_s21 = smov [#allocation2]  }
 0x5d5   : > { %s431_s24 = scalar_lea.vmem [#allocation2], %s1936_s20 }
 0x5d6   : > { %s1873_s30 = sshll.u32 %s431_s24, 4  ;;  %s2665_s30 = int_to_ptr.vmem [resolvable:$true] %s1873_s30 }
 0x5d7   : > { %s2194_s20 = scalar_lea.vmem %s2665_s30, 128 }
 0x5d8   : > { %1572 = vrot.lane.b32.xlu1 %v1562_v56, %s2269_s22  ;;  %p2195_p11 = scmp.ne.s32.totalorder %s2665_s30, %s2194_s20  ;;  %s2198_s22 = sshll.u32 %s2270_s21, 4  ;;  %s2199_s22 = int_to_ptr.vmem [resolvable:$false] %s2198_s22 }
 0x5d9   : > { %s2200_s2 = scalar_lea.vmem %s2199_s22, 256  ;;  %p2201_p0 = scmp.lt.s32.totalorder %s2665_s30, %s2199_s22 }
 0x5da   : > { %p2196_p12 = pnand %p2195_p11, %p2379_p5  ;;  %p2202_p1 = scmp.lt.s32.totalorder %s2200_s2, %s2194_s20 }
 0x5dc   : > { %p2197_p13 = pneg %p2196_p12  ;;  %p2203_p2 = por %p2202_p1, %p2201_p0 }
 0x5de   : > { %p2204_p3 = pnand %p2203_p2, %p2197_p13 }
 0x646   : > { %v1569_v41 = vpop.permute.xlu1 %1568  ;;  %v1565_v58 = vpop.permute.xlu0 %1564 }
 0x647   : > { %v1575_v59 = vsel %vm998_vm2, %v1559_v57, %v1565_v58 }
 0x648   : > { %v1577_v61 = vsel %vm1576_vm5, %v1575_v59, %v1569_v41 }
 0x64a   : > { %v1573_v60 = vpop.permute.xlu1 %1572 }
 0x64b   : > { %v1579_v62 = vsel %vm1578_vm6, %v1577_v61, %v1573_v60 }
 0x64c   : > { %v1580_v47 = vpack.c.bf16 %v1579_v62, %v1579_v62 }
 0x64e   : > { %2078 = vmatmul.mubr.msk.bf16.vlgmr.msra.gmra.mrb[12].mxu1 %vm440_vm0, %v1580_v47 }
 0x64f   : > { %2105 = vmatprep.mubr.msk.bf16.mxu1 %vm2259_vm1, %v2258_v8  ;;  %2090 = vmatpush3.bf16.msra.mxu1 %v2166_v15 }
 0x650   : > { %2091 = vmatprep.subr.bf16.mxu1 %v2258_v8 }
 0x653   : > { %2092 = vmatpush3.bf16.msra.mxu1 %v2167_v16 }
 0x654   : > { %2093 = vmatprep.subr.bf16.mxu1 %v2258_v8 }
 0x657   : > { %2094 = vmatpush3.bf16.msra.mxu1 %v2168_v17 }
 0x658   : > { %2095 = vmatprep.subr.bf16.mxu1 %v2258_v8 }
 0x65b   : > { %2096 = vmatpush3.bf16.msra.mxu1 %v2169_v18 }
 0x65c   : > { %2097 = vmatprep.subr.bf16.mxu1 %v2258_v8 }
 0x65f   : > { %2098 = vmatpush3.bf16.msra.mxu1 %v2170_v19 }
 0x660   : > { %2099 = vmatprep.subr.bf16.mxu1 %v2258_v8 }
 0x663   : > { %2100 = vmatpush3.bf16.msra.mxu1 %v2171_v20 }
 0x664   : > { %2101 = vmatprep.subr.bf16.mxu1 %v2258_v8 }
 0x667   : > { %2102 = vmatpush3.bf16.msra.mxu1 %v2172_v32 }
 0x668   : > { %2103 = vmatprep.subr.bf16.mxu1 %v2258_v8  ;;  %v1970_v8 = vld [vmem:[%s2718_s12] ss:$0 sm:$0xff] }
 0x66b   : > { %2104 = vmatpush3.bf16.msra.mxu1 %v2173_v34 }
 0x721   : > { %v1641_v1 = vpop.f32.mrb[12].mxu1 }
 0x722   : > { %v1642_v2 = vadd.f32 %v1960_v63, %v1641_v1  ;;  %v2079_v3 = vpop.f32.mrb[13].mxu1 }
 0x723   : > { %v1644_v4 = vpop.f32.mrb[14].mxu1 }
 0x724   : > { %v2600_v5 = vadd.f32 %v1642_v2, %v2394_v0  ;;  %v2080_v6 = vpop.f32.mrb[15].mxu1  ;;  %v2165_v0 = vld [vmem:[%s2715_s9 + $0x8] sm:$0xff]  }
 0x725   : > { %2084 = vmatpush3.bf16.msra.mxu0 %v2165_v0 }
 0x726   : > { %v1650_v7 = vsel %vm440_vm0, %v2600_v5, 0.0 }
 0x727   : > { %1651 = vadd.xlane.f32.xlu0 %v1650_v7 }
 0x7b4   : > { %v1652_v9 = vpop.xlane.xlu0 %1651 }
 0x7b5   : > { %v1653_v10 = vmul.f32 0.03125, %v1652_v9 }
 0x7b7   : > { %v1654_v11 = vsub.f32 %v2600_v5, %v1653_v10 }
 0x7b9   : > { %v1655_v12 = vmul.f32 %v1654_v11, %v1654_v11 }
 0x7bb   : > { %v1656_v13 = vsel %vm440_vm0, %v1655_v12, 0.0 }
 0x7bc   : > { %1657 = vadd.xlane.f32.xlu1 %v1656_v13 }
 0x849   : > { %v1658_v21 = vpop.xlane.xlu1 %1657 }
 0x84a   : > { %v1659_v22 = vmul.f32 0.03125, %v1658_v21 }
 0x84c   : > { %v1660_v23 = vadd.f32 1e-05, %v1659_v22 }
 0x84e   : > { %2192 = vrsqrt.f32 %v1660_v23 }
 0x858   : > { %v2193_v24 = vpop.eup %2192 }
 0x859   : > { %v1662_v25 = vmul.f32 %v2193_v24, %v1654_v11 }
 0x85b   : > { %v1669_v27 = vmul.f32 %v1964_v33, %v1662_v25 }
 0x85d   : > { %v1676_v30 = vadd.f32 %v1965_v26, %v1669_v27 }
 0x85f   : > { %v1677_v31 = vpack.c.bf16 %v1676_v30, %v1676_v30 }
 0x861   : > { %2086 = vmatmul.mubr.msk.bf16.vlgmr.msra.gmra.mrb[24].mxu0 %vm440_vm0, %v1677_v31 }
 0x934   : > { %v1738_v37 = vpop.f32.mrb[24].mxu0 }
 0x935   : > { %v1739_v40 = vadd.f32 %v1966_v35, %v1738_v37  ;;  %v2087_v28 = vpop.f32.mrb[25].mxu0 }
 0x936   : > { %v1741_v42 = vpop.f32.mrb[26].mxu0 }
 0x937   : > { %v1744_v43 = vmax.f32 %v1739_v40, 0.0  ;;  %v2088_v29 = vpop.f32.mrb[27].mxu0 }
 0x939   : > { %v1745_v44 = vpack.c.bf16 %v1744_v43, %v1744_v43 }
 0x93b   : > { %2106 = vmatmul.mubr.bf16.vlgmr.msra.gmra.mrb[16].mxu1 %v1745_v44 }
 0xa0e   : > { %v1851_v45 = vpop.f32.mrb[16].mxu1 }
 0xa0f   : > { %v1852_v46 = vadd.f32 %v1970_v8, %v1851_v45  ;;  %v2107_v48 = vpop.f32.mrb[17].mxu1 }
 0xa10   : > { %v1854_v49 = vpop.f32.mrb[18].mxu1 }
 0xa11   : > { %v1857_v50 = vadd.f32 %v1852_v46, %v2600_v5  ;;  %v2108_v51 = vpop.f32.mrb[19].mxu1 }
 0xa13   : > { %1858 = vst.msk [vmem:[%s431_s24] sm:$0xff] %vm440_vm0, %v1857_v50 }
 0xa14   : > { %2207 = shalt.err (!%p2204_p3)
}
 0xa15   : > { %s2208_s0 = scalar_lea.hbm %s2663_s1, 128  ;;  %s2212_s24 = scalar_lea.hbm %s2719_s13, 256 }
 0xa16   : > { %p2209_p4 = scmp.ne.s32.totalorder %s2663_s1, %s2208_s0  ;;  %p2213_p9 = scmp.lt.u32.totalorder %s2663_s1, %s2719_s13 }
 0xa17   : > { %p2214_p10 = scmp.lt.u32.totalorder %s2212_s24, %s2208_s0  ;;  %p2216_p12 = scmp.lt.u32.totalorder %s2208_s0, %s2663_s1 }
 0xa18   : > { %p2210_p7 = pnand %p2209_p4, %p2379_p5 }
 0xa19   : > { %p2215_p11 = por %p2214_p10, %p2213_p9 }
 0xa1a   : > { %p2211_p8 = pneg %p2210_p7 }
 0xa1b   : > { %p2217_p13 = por %p2216_p12, %p2215_p11 }
 0xa1d   : > { %p2218_p0 = pnand %p2217_p13, %p2211_p8 }
 0xa1f   : > { %2221 = shalt.err (!%p2218_p0)
}
 0xa20   : > { %2109 = dma.vmem_to_hbm [thread:$0]  (%p2379_p5), %s2665_s30, 128, %s2663_s1, %s1860_s29  }
 0xa21 PF: > { %p2115_p1 = scmp.ge.s32.totalorder %s2256_s28, 2  ;;  %s1885_s2 = sand.u32 1, %s2244_s25  }
 0xa22   : > { %s1886_s20 = scalar_lea.sflag [#allocation3], %s1885_s2 }
 0xa23   : > { %p2112_p2 = pnand %p2115_p1, %p2383_p6 }
 0xa25   : > { %2239 = dma.done.wait (!%p2112_p2), %s1886_s20, 128  }
 0xa26   : > { %2241 = vsyncadd (!%p2112_p2), %s1886_s20, 4294967168  ;;  %p23_p3 = scmp.ge.s32.totalorder %s2366_s14, 4   ;;  %s2728_s25 = smov %s2248_s26 }
 0xa27   : > { %s2729_s26 = smov %s2252_s27  ;;  %s2730_s27 = smov %s2377_s17 }
 0xa28   : > { %s2731_s28 = smov %s2366_s14  ;;  %25 = sbr.rel (!%p23_p3) target bundleno = 7 (0x7), region = 107 }
 0xa2f   :  { %1891 = vsyncpa [#allocation3], 1 }
 0xa30   :  { %1893 = vsyncpa [#allocation3 + $0x1], 1 }

</bundles_post_ra>
